<compile_context>
chip_gen: v5e
topology: v5e:2x2
jax: 0.10.0
libtpu: 0.0.40
codegen_flags: <defaults>
</compile_context>

<pallas_src>
import jax
import jax.numpy as jnp
from jax.experimental import pallas as pl
from jax.experimental.pallas import tpu as pltpu


def _pool_kernel_direct(batch_ref, x_ref, out_ref):
    """f32 output: accumulate straight into the resident output block."""
    i = pl.program_id(1)  # node-tile (reduction) axis

    @pl.when(i == 0)
    def _():
        out_ref[...] = jnp.zeros_like(out_ref)

    b_ids = batch_ref[0]                                          # (1, TN) int32
    nseg = out_ref.shape[0]
    seg_iota = jax.lax.broadcasted_iota(
        jnp.int32, (nseg, b_ids.shape[1]), 0)                     # (B, TN)
    onehot = (seg_iota == b_ids).astype(x_ref.dtype)              # (B, TN)

    out_ref[...] += jax.lax.dot_general(
        onehot,
        x_ref[...],                                               # (TN, F_TILE)
        dimension_numbers=(((1,), (0,)), ((), ())),
        preferred_element_type=jnp.float32,
    )


def _pool_kernel_acc(batch_ref, x_ref, out_ref, acc_ref):
    """Non-f32 output: accumulate in a f32 VMEM scratch, cast on the last step."""
    i = pl.program_id(1)

    @pl.when(i == 0)
    def _():
        acc_ref[...] = jnp.zeros_like(acc_ref)

    b_ids = batch_ref[0]                                          # (1, TN) int32
    nseg = acc_ref.shape[0]
    seg_iota = jax.lax.broadcasted_iota(
        jnp.int32, (nseg, b_ids.shape[1]), 0)                     # (B, TN)
    onehot = (seg_iota == b_ids).astype(x_ref.dtype)              # (B, TN)

    acc_ref[...] += jax.lax.dot_general(
        onehot,
        x_ref[...],
        dimension_numbers=(((1,), (0,)), ((), ())),
        preferred_element_type=jnp.float32,
    )

    @pl.when(i == pl.num_programs(1) - 1)
    def _():
        out_ref[...] = acc_ref[...].astype(out_ref.dtype)


def global_add_pool(x, batch, num_graphs, *, node_tile=512, feat_tile=512):
    """x: [N, F] float, batch: [N] int, returns [num_graphs, F] segment sums."""
    N, F = x.shape
    out_dtype = x.dtype
    assert node_tile % 128 == 0, "node_tile must be a multiple of 128"
    assert feat_tile % 128 == 0, "feat_tile must be a multiple of 128"

    # --- lane/sublane-dense padded shapes -------------------------------------
    # Clamp tiles to the (128-aligned) problem size so small inputs don't pad up
    # to a full 512-wide tile of zeros.
    n_pad128 = int(pl.cdiv(N, 128)) * 128
    node_tile = min(node_tile, n_pad128)
    F_pad = int(pl.cdiv(F, 128)) * 128
    feat_tile = min(feat_tile, F_pad)

    N_pad = int(pl.cdiv(N, node_tile)) * node_tile
    B_pad = max(8, int(pl.cdiv(num_graphs, 8)) * 8)
    if F_pad <= feat_tile:
        f_tile = F_pad
    else:
        f_tile = feat_tile if F_pad % feat_tile == 0 else 128

    x_p = x
    if (N_pad, F_pad) != (N, F):
        x_p = jnp.pad(x, ((0, N_pad - N), (0, F_pad - F)))
    batch_p = batch.astype(jnp.int32)
    if N_pad != N:
        # padded rows get an out-of-range id so they never hit any segment
        batch_p = jnp.pad(batch_p, (0, N_pad - N), constant_values=B_pad)
    n_tiles = N_pad // node_tile
    batch_3d = batch_p.reshape(n_tiles, 1, node_tile)             # lane-dense ids

    grid = (F_pad // f_tile, n_tiles)                             # (parallel, reduction)

    in_specs = [
        pl.BlockSpec((1, 1, node_tile), lambda j, i: (i, 0, 0)),  # batch ids
        pl.BlockSpec((node_tile, f_tile), lambda j, i: (i, j)),   # node features
    ]
    out_spec = pl.BlockSpec((B_pad, f_tile), lambda j, i: (0, j))

    direct = out_dtype == jnp.float32
    kernel = _pool_kernel_direct if direct else _pool_kernel_acc
    scratch = [] if direct else [pltpu.VMEM((B_pad, f_tile), jnp.float32)]

    out_full = pl.pallas_call(
        kernel,
        out_shape=jax.ShapeDtypeStruct((B_pad, F_pad), out_dtype),
        grid_spec=pltpu.PrefetchScalarGridSpec(
            num_scalar_prefetch=0,
            grid=grid,
            in_specs=in_specs,
            out_specs=out_spec,
            scratch_shapes=scratch,
        ),
        compiler_params=pltpu.CompilerParams(
            # feature tiles are independent (megacore on v7x); node axis is a reduction
            dimension_semantics=("parallel", "arbitrary"),
            vmem_limit_bytes=64 * 1024 * 1024,
        ),
    )(batch_3d, x_p)

    return out_full[:num_graphs, :F]


if __name__ == "__main__":
    key = jax.random.PRNGKey(0)
    kx, kb = jax.random.split(key)

    N, F, B = 32, 32, 4          # nodes, feature dim, number of graphs
    x = jax.random.normal(kx, (N, F), dtype=jnp.float32)
    # deterministic graph assignment: sorted ids over B graphs
    batch = jnp.sort(jax.random.randint(kb, (N,), 0, B, dtype=jnp.int32))

    out = global_add_pool(x, batch, B)
    out = jax.block_until_ready(out)

    # reference check with plain JAX scatter-add (segment sum)
    ref = jnp.zeros((B, F), dtype=x.dtype).at[batch].add(x)
    assert out.shape == (B, F)
    assert jnp.allclose(out, ref, atol=1e-5, rtol=1e-5)

    print("KERNEL_OK")
</pallas_src>

<mosaic_0001>
module attributes {stable_mosaic.version = 11 : i64} {
  func.func @_pool_kernel_direct(%arg0: i32, %arg1: i32, %arg2: memref<1x1x128xi32, #tpu.memory_space<vmem>>, %arg3: memref<128x128xf32, #tpu.memory_space<vmem>>, %arg4: memref<8x128xf32, #tpu.memory_space<vmem>>) attributes {dimension_semantics = [#tpu.dimension_semantics<parallel>, #tpu.dimension_semantics<arbitrary>], iteration_bounds = array<i64: 1, 1>, scalar_prefetch = 0 : i64, scratch_operands = 0 : i64, tpu.core_type = #tpu.core_type<tc>, window_params = [{transform_indices = @transform_0, window_bounds = array<i64: 1, 1, 128>}, {transform_indices = @transform_1, window_bounds = array<i64: 128, 128>}, {transform_indices = @transform_2, window_bounds = array<i64: 8, 128>}]} {
    %c0_i32 = arith.constant 0 : i32
    %0 = arith.cmpi eq, %arg1, %c0_i32 : i32
    %1 = arith.extui %0 : i1 to i32
    %c0_i32_0 = arith.constant 0 : i32
    %2 = arith.cmpi ne, %1, %c0_i32_0 : i32
    scf.if %2 {
      %cst_9 = arith.constant 0.000000e+00 : f32
      %15 = vector.broadcast %cst_9 : f32 to vector<8x128xf32>
      %c0_10 = arith.constant 0 : index
      %c0_11 = arith.constant 0 : index
      %16 = vector.load %arg4[%c0_10, %c0_11] : memref<8x128xf32, #tpu.memory_space<vmem>>, vector<8x128xf32>
      tpu.vector_store %arg4[%c0_10, %c0_11], %15 {strides = array<i32>} : memref<8x128xf32, #tpu.memory_space<vmem>>, vector<8x128xf32>,
    } else {
    }
    %c0 = arith.constant 0 : index
    %c0_1 = arith.constant 0 : index
    %c0_2 = arith.constant 0 : index
    %3 = vector.load %arg2[%c0, %c0_1, %c0_2] : memref<1x1x128xi32, #tpu.memory_space<vmem>>, vector<1x1x128xi32>
    %4 = vector.shape_cast %3 : vector<1x1x128xi32> to vector<1x128xi32>
    %5 = tpu.iota {dimensions = array<i32: 0>} : vector<8x128xi32>
    %6 = vector.broadcast %4 : vector<1x128xi32> to vector<8x128xi32>
    %7 = arith.cmpi eq, %5, %6 : vector<8x128xi32>
    %8 = arith.extui %7 : vector<8x128xi1> to vector<8x128xi32>
    %9 = arith.sitofp %8 : vector<8x128xi32> to vector<8x128xf32>
    %c0_3 = arith.constant 0 : index
    %c0_4 = arith.constant 0 : index
    %10 = vector.load %arg4[%c0_3, %c0_4] : memref<8x128xf32, #tpu.memory_space<vmem>>, vector<8x128xf32>
    %c0_5 = arith.constant 0 : index
    %c0_6 = arith.constant 0 : index
    %11 = vector.load %arg3[%c0_5, %c0_6] : memref<128x128xf32, #tpu.memory_space<vmem>>, vector<128x128xf32>
    %cst = arith.constant dense<0.000000e+00> : vector<8x128xf32>
    %12 = tpu.matmul %9, %11, %cst {dimension_numbers = #tpu.dot_dimension_numbers<[1], [0], [0], [1], [0, 0, 1, 1], [], []>} : vector<8x128xf32>, vector<128x128xf32>, vector<8x128xf32> -> vector<8x128xf32>
    %13 = arith.addf %10, %12 : vector<8x128xf32>
    %c0_7 = arith.constant 0 : index
    %c0_8 = arith.constant 0 : index
    %14 = vector.load %arg4[%c0_7, %c0_8] : memref<8x128xf32, #tpu.memory_space<vmem>>, vector<8x128xf32>
    tpu.vector_store %arg4[%c0_7, %c0_8], %13 {strides = array<i32>} : memref<8x128xf32, #tpu.memory_space<vmem>>, vector<8x128xf32>,
    return
  }
  func.func @transform_0(%arg0: i32, %arg1: i32) -> (i32, i32, i32) {
    %c0_i32 = arith.constant 0 : i32
    %c0_i32_0 = arith.constant 0 : i32
    %c0_i32_1 = arith.constant 0 : i32
    return %arg1, %c0_i32, %c0_i32_0 : i32, i32, i32
  }
  func.func @transform_1(%arg0: i32, %arg1: i32) -> (i32, i32) {
    %c0_i32 = arith.constant 0 : i32
    return %arg1, %arg0 : i32, i32
  }
  func.func @transform_2(%arg0: i32, %arg1: i32) -> (i32, i32) {
    %c0_i32 = arith.constant 0 : i32
    %c0_i32_0 = arith.constant 0 : i32
    return %c0_i32, %arg0 : i32, i32
  }
}

</mosaic_0001>

<bundles_post_ra>
// kernel: tpu_custom_call.1
= control target key start
LH: loop header
LB: loop body
LE: loop exit
PB: predicated region body
PF: predicated region fallthrough
CT: control target
= control target key end

     0   :  { %7 = vsyncpa [#allocation3], 0  ;;  %s229_s0 = inlined_call_operand.hbm [shape: s32[1,1,128], index: 0, kind: input, shape index: {}]   ;;  %s230_s1 = inlined_call_operand.hbm [shape: f32[128,128], index: 1, kind: input, shape index: {}]   ;;  %s231_s2 = inlined_call_operand.hbm [shape: f32[8,128], index: 2, kind: output, shape index: {}]  }
   0x1   :  { %8 = vsyncpa [#allocation6], 0 }
   0x2   :  { %9 = vsyncpa [#allocation4], 0  ;;  %s15_s11 = sshll.u32 %s229_s0, 4  ;;  %s199_s12 = smov [#allocation2]   ;;  %s16_s11 = int_to_ptr.hbm [resolvable:$true] %s15_s11 }
   0x3   :  { %s17_s13 = sshll.u32 %s199_s12, 4  ;;  %s25_s16 = sshll.u32 %s230_s1, 4  ;;  %s18_s13 = int_to_ptr.vmem [resolvable:$true] %s17_s13  ;;  %s26_s16 = int_to_ptr.hbm [resolvable:$true] %s25_s16 }
   0x4   :  { %20 = dma.hbm_to_vmem [thread:$0]  %s16_s11, 16, %s18_s13, [#allocation3]  }
   0x5   :  { %s200_s17 = smov [#allocation5]   ;;  %s201_s19 = smov 128  }
   0x6   :  { %s27_s18 = sshll.u32 %s200_s17, 4  ;;  %s202_s20 = smov 8   ;;  %s28_s18 = int_to_ptr.vmem [resolvable:$true] %s27_s18 }
   0x7   :  { %33 = dma.hbm_to_vmem [thread:$0]  %s26_s16, 2048, %s28_s18, [#allocation6], %s201_s19, %s201_s19, %s202_s20  }
   0x8   :  { %193 = dma.done.wait [#allocation3], 16  }
   0x9   :  { %194 = vsyncadd [#allocation3], 4294967280 }
   0xa   :  { %195 = dma.done.wait [#allocation6], 2048  }
   0xb   :  { %196 = vsyncadd [#allocation6], 4294965248  ;;  %v70_v0 = vld [vmem:[#allocation5 + $0x78] sm:$0xff]  ;;  %v69_v1 = vld [vmem:[#allocation5 + $0x70] sm:$0xff]  ;;  %v48_v12 = vlaneseq  ;;  %v203_v19 = vmov 1.0   ;;  %s204_s0 = smov [#allocation7]  }
   0xc   :  { %71 = vmatpush.msra.mxu0 %v70_v0  ;;  %v68_v2 = vld [vmem:[#allocation5 + $0x68] sm:$0xff]  ;;  %v67_v3 = vld [vmem:[#allocation5 + $0x60] sm:$0xff]  ;;  %v66_v4 = vld [vmem:[#allocation5 + $0x58] sm:$0xff]  ;;  %s98_s1 = sshll.u32 %s204_s0, 4  ;;  %s100_s23 = sshll.u32 %s231_s2, 4  ;;  %s99_s1 = int_to_ptr.vmem [resolvable:$true] %s98_s1  ;;  %s101_s23 = int_to_ptr.hbm [resolvable:$true] %s100_s23 }
   0xd   :  { %v65_v5 = vld [vmem:[#allocation5 + $0x50] sm:$0xff]  ;;  %v64_v6 = vld [vmem:[#allocation5 + $0x48] sm:$0xff]  ;;  %v63_v7 = vld [vmem:[#allocation5 + $0x40] sm:$0xff]  ;;  %v49_v15 = vshrl.u32 %v48_v12, 7 }
   0xe   :  { %72 = vmatpush.msra.mxu0 %v69_v1  ;;  %v62_v8 = vld [vmem:[#allocation5 + $0x38] sm:$0xff]  ;;  %v61_v9 = vld [vmem:[#allocation5 + $0x30] sm:$0xff]  ;;  %v60_v10 = vld [vmem:[#allocation5 + $0x28] sm:$0xff] }
   0xf   :  { %v59_v11 = vld [vmem:[#allocation5 + $0x20] sm:$0xff]  ;;  %v58_v13 = vld [vmem:[#allocation5 + $0x18] sm:$0xff]  ;;  %v57_v14 = vld [vmem:[#allocation5 + $0x10] sm:$0xff] }
  0x10   :  { %73 = vmatpush.msra.mxu0 %v68_v2  ;;  %v120_v16 = vld [vmem:[#allocation2] ss:$0 sm:$0xff]  ;;  %v56_v17 = vld [vmem:[#allocation5 + $0x8] sm:$0xff]  ;;  %v55_v18 = vld [vmem:[#allocation5] sm:$0xff] }
  0x11   :  { %vm51_vm0 = vcmp.eq.s32.totalorder %v49_v15, %v120_v16 }
  0x12   :  { %74 = vmatpush.msra.mxu0 %v67_v3 }
  0x14   :  { %75 = vmatpush.msra.mxu0 %v66_v4 }
  0x16   :  { %76 = vmatpush.msra.mxu0 %v65_v5 }
  0x18   :  { %77 = vmatpush.msra.mxu0 %v64_v6 }
  0x1a   :  { %78 = vmatpush.msra.mxu0 %v63_v7 }
  0x1c   :  { %79 = vmatpush.msra.mxu0 %v62_v8 }
  0x1e   :  { %80 = vmatpush.msra.mxu0 %v61_v9 }
  0x20   :  { %81 = vmatpush.msra.mxu0 %v60_v10 }
  0x22   :  { %82 = vmatpush.msra.mxu0 %v59_v11 }
  0x24   :  { %83 = vmatpush.msra.mxu0 %v58_v13 }
  0x26   :  { %84 = vmatpush.msra.mxu0 %v57_v14 }
  0x28   :  { %85 = vmatpush.msra.mxu0 %v56_v17 }
  0x2a   :  { %86 = vmatpush.msra.mxu0 %v55_v18 }
  0x2b   :  { %112 = vmatmul.msk.f32.vlgmr.msra.gmra.mxu0 %vm51_vm0, %v203_v19 }
  0xa8   :  { %v88_v20 = vpop.f32.mrf.mxu0 }
  0xa9   :  { %92 = vst [vmem:[#allocation7] sm:$0xff] %v88_v20 }
  0xaa   :  { %103 = dma.vmem_to_hbm [thread:$0]  %s99_s1, 128, %s101_s23, [#allocation4]  }
  0xab   :  { %197 = dma.done.wait [#allocation4], 128  }
  0xac   :  { %198 = vsyncadd [#allocation4], 4294967168 }
  0xad   :  { %108 = vsyncpa [#allocation3], 1 }
  0xae   :  { %109 = vsyncpa [#allocation6], 1 }
  0xaf   :  { %110 = vsyncpa [#allocation4], 1 }

</bundles_post_ra>
